<compile_context>
chip_gen: v7x
topology: tpu7x:2x2x1
jax: 0.10.0
libtpu: 0.0.40
codegen_flags: <defaults>
</compile_context>

<pallas_src>
import functools
import itertools

import numpy as np
import jax
import jax.numpy as jnp
from jax.experimental import pallas as pl
from jax.experimental.pallas import tpu as pltpu

W0_FEATS = 8      # hidden width after fc0 / fc1 (module hard-codes w0 = w1 = 8)
N_LEVEL = 3       # TMGP sparse-grid level (module hard-codes n_level=3)
_NEG_BIG = -1e30  # bias for padded logit lanes (kills them in log_softmax)


def _round_up(n, m):
    return ((n + m - 1) // m) * m


# --------------------------------- kernel ----------------------------------
def dtmgp_kernel(x_ref, dT_ref, p0_ref, p1_ref, p2_ref, out_ref):
    f32 = jnp.float32
    x = x_ref[...]                 # (tb, d_pad)       mm_dtype (zero-pad cols)
    design_t = dT_ref[...]         # (8, mp)           f32 (zero-padded cols)
    p0 = p0_ref[...]               # (d_pad+1, 8)      rows[:d_pad]=W0^T, last=b0
    p1 = p1_ref[...]               # (mp+1, 8)         rows[:mp]=chol_inv@W1^T
    p2 = p2_ref[...]               # (mp+1, out_pad)   rows[:mp]=chol_inv@W2^T

    d_pad = p0.shape[0] - 1
    mp = p1.shape[0] - 1
    mm = x.dtype

    # fc0 (weights pre-sampled in the wrapper) + ReLU
    h = (jnp.dot(x, p0[:d_pad], preferred_element_type=f32)
         + p0[d_pad:].astype(f32))
    h = jnp.maximum(h, 0.0)

    # tmk1 + fc1: k_star @ (chol_inv @ W1^T) + b1.
    # Laplace product kernel distances via one broadcast + sublane reduction.
    # TODO(synk): real TMGP rescales inputs into the sparse-grid design domain
    # and builds chol_inv via tmk_chol_inv; here chol_inv is a dense inverse
    # Cholesky precomputed on the host and folded into p1/p2.
    k1 = jnp.exp(-jnp.sum(jnp.abs(h[:, :, None] - design_t[None]), axis=1))
    h1 = (jnp.dot(k1.astype(mm), p1[:mp], preferred_element_type=f32)
          + p1[mp:].astype(f32))

    # tmk2 + fc2 (padded logit lanes carry bias -1e30 -> vanish in softmax)
    k2 = jnp.exp(-jnp.sum(jnp.abs(h1[:, :, None] - design_t[None]), axis=1))
    logits = (jnp.dot(k2.astype(mm), p2[:mp], preferred_element_type=f32)
              + p2[mp:].astype(f32))

    # log_softmax over lanes
    mx = jnp.max(logits, axis=1, keepdims=True)
    z = logits - mx
    lse = jnp.log(jnp.sum(jnp.exp(z), axis=1, keepdims=True))
    out_ref[...] = (z - lse).astype(out_ref.dtype)


# -------------------------- hoisted (XLA) wrapper ---------------------------
def _kl_mean(mu, sigma):
    # KL( N(mu, sigma) || N(0, 1) ), elementwise mean (bayesian-torch kl_div).
    return jnp.mean(-jnp.log(sigma) + 0.5 * (sigma * sigma + mu * mu) - 0.5)


def _sample_linear(layer):
    w_mu, w_rho, w_eps, b_mu, b_rho, b_eps = layer
    w_sigma = jax.nn.softplus(w_rho)   # logaddexp form: overflow-safe
    b_sigma = jax.nn.softplus(b_rho)
    w = w_mu + w_sigma * w_eps
    b = b_mu + b_sigma * b_eps
    kl = _kl_mean(w_mu, w_sigma) + _kl_mean(b_mu, b_sigma)
    return w, b, kl


@functools.partial(jax.jit, static_argnames=("block_b", "mm_dtype"))
def dtmgp_forward(x_nchw, params, design, chol_inv, *, block_b=256,
                  mm_dtype=jnp.float32):
    b = x_nchw.shape[0]
    x = x_nchw.reshape(b, -1).astype(jnp.float32)       # torch.flatten(x, 1)
    d_in = x.shape[1]
    d_pad = _round_up(d_in, 128)                        # lane-dense x / fc0

    # Batch-independent work hoisted out of the kernel.
    w0, b0, kl0 = _sample_linear(params[0])
    w1, b1, kl1 = _sample_linear(params[1])
    w2, b2, kl2 = _sample_linear(params[2])
    kl = kl0 + kl1 + kl2

    m, n_feat = design.shape                            # (161, 8)
    out_dim = w2.shape[0]
    mp = _round_up(m, 128)                              # 256
    out_pad = _round_up(out_dim, 128)                   # 128

    # Padded design (zero cols) -> padded k_star cols hit zero weight rows.
    design_t = jnp.zeros((n_feat, mp), jnp.float32).at[:, :m].set(design.T)

    # Fold chol_inv into the downstream weights; zero-fill padded rows.
    w1f = jnp.zeros((mp, w1.shape[0]), jnp.float32).at[:m].set(chol_inv @ w1.T)
    w2f = jnp.zeros((mp, out_pad), jnp.float32).at[:m, :out_dim].set(
        chol_inv @ w2.T)
    b2p = jnp.full((1, out_pad), _NEG_BIG, jnp.float32).at[:, :out_dim].set(b2)

    # Pack [W ; b] per layer -> 3 parameter refs (zero-pad fc0's input rows).
    w0p = jnp.zeros((d_pad, w0.shape[0]), jnp.float32).at[:d_in].set(w0.T)
    p0 = jnp.concatenate([w0p, b0], axis=0).astype(mm_dtype)    # (d_pad+1, 8)
    p1 = jnp.concatenate([w1f, b1], axis=0).astype(mm_dtype)    # (mp+1, 8)
    p2 = jnp.concatenate([w2f, b2p], axis=0).astype(mm_dtype)   # (mp+1, 128)

    # Batch grid: block of `tb` rows; weights/design resident across steps.
    tb = min(block_b, _round_up(b, 8))
    b_pad = _round_up(b, tb)
    x_pad = jnp.zeros((b_pad, d_pad), mm_dtype).at[:b, :d_in].set(
        x.astype(mm_dtype))

    const2 = lambda i: (0, 0)
    out = pl.pallas_call(
        dtmgp_kernel,
        out_shape=jax.ShapeDtypeStruct((b_pad, out_pad), jnp.float32),
        grid=(b_pad // tb,),
        in_specs=[
            pl.BlockSpec((tb, d_pad), lambda i: (i, 0)),
            pl.BlockSpec((n_feat, mp), const2),
            pl.BlockSpec((d_pad + 1, w0.shape[0]), const2),
            pl.BlockSpec((mp + 1, w1.shape[0]), const2),
            pl.BlockSpec((mp + 1, out_pad), const2),
        ],
        out_specs=pl.BlockSpec((tb, out_pad), lambda i: (i, 0)),
        compiler_params=pltpu.CompilerParams(
            dimension_semantics=("parallel",)),
    )(x_pad, design_t, p0, p1, p2)
    return out[:b, :out_dim], kl


# --------------------- pure-JAX reference (correctness) ---------------------
def reference_forward(x_nchw, params, design, chol_inv):
    x = x_nchw.reshape(x_nchw.shape[0], -1).astype(jnp.float32)
    w0, b0, kl0 = _sample_linear(params[0])
    w1, b1, kl1 = _sample_linear(params[1])
    w2, b2, kl2 = _sample_linear(params[2])

    def tmgp(h):
        dist = jnp.sum(jnp.abs(h[:, None, :] - design[None, :, :]), axis=-1)
        return jnp.exp(-dist) @ chol_inv

    h = jax.nn.relu(x @ w0.T + b0)
    h = tmgp(h) @ w1.T + b1
    logits = tmgp(h) @ w2.T + b2
    return jax.nn.log_softmax(logits, axis=1), kl0 + kl1 + kl2


# ----------------------------- host-side setup ------------------------------
def sparse_grid_design(d, n_level):
    """Hyperbolic-cross sparse-grid design points in [0,1]^d (dyadic)."""
    def new_points(level):
        if level == 1:
            return [0.5]
        n = 2 ** level
        return [k / n for k in range(1, n, 2)]
    max_sum = d + n_level - 1
    pts = []
    for idx in itertools.product(range(1, n_level + 1), repeat=d):
        if sum(idx) <= max_sum:
            for combo in itertools.product(*[new_points(l) for l in idx]):
                pts.append(combo)
    return np.asarray(pts, dtype=np.float64)          # (M, d)


def laplace_product_kernel_np(a, b):
    return np.exp(-np.abs(a[:, None, :] - b[None, :, :]).sum(-1))


def init_linear_params(key, in_f, out_f):
    # bayesian-torch init: mu ~ N(0, 0.1), rho ~ N(-3, 0.1), eps ~ N(0, 1)
    # (eps is resampled every forward in torch; deterministic here).
    ks = jax.random.split(key, 6)
    w_mu = 0.1 * jax.random.normal(ks[0], (out_f, in_f), jnp.float32)
    w_rho = 0.1 * jax.random.normal(ks[1], (out_f, in_f), jnp.float32) - 3.0
    w_eps = jax.random.normal(ks[2], (out_f, in_f), jnp.float32)
    b_mu = 0.1 * jax.random.normal(ks[3], (1, out_f), jnp.float32)
    b_rho = 0.1 * jax.random.normal(ks[4], (1, out_f), jnp.float32) - 3.0
    b_eps = jax.random.normal(ks[5], (1, out_f), jnp.float32)
    return (w_mu, w_rho, w_eps, b_mu, b_rho, b_eps)


if __name__ == "__main__":
    key = jax.random.PRNGKey(0)
    kx, k0, k1, k2 = jax.random.split(key, 4)

    # small MNIST-like input: B=2, C=1, 16x16  ->  input_dim = 256
    B, C, H, W = 2, 1, 16, 16
    input_dim = C * H * W
    output_dim = 10

    x = jax.random.normal(kx, (B, C, H, W), jnp.float32)

    # sparse-grid design for (in_features=8, n_level=3): 161 points,
    # shared structurally by tmk1 and tmk2.
    design_np = sparse_grid_design(W0_FEATS, N_LEVEL)              # (161, 8)
    M = design_np.shape[0]
    K = laplace_product_kernel_np(design_np, design_np) + 1e-6 * np.eye(M)
    L = np.linalg.cholesky(K)
    chol_inv = jnp.asarray(np.linalg.inv(L).T, dtype=jnp.float32)  # (M, M)
    design = jnp.asarray(design_np, dtype=jnp.float32)             # (M, 8)

    params = (
        init_linear_params(k0, input_dim, W0_FEATS),   # fc0: 256 -> 8
        init_linear_params(k1, M, W0_FEATS),           # fc1: 161 -> 8
        init_linear_params(k2, M, output_dim),         # fc2: 161 -> 10
    )

    out, kl = dtmgp_forward(x, params, design, chol_inv)
    jax.block_until_ready((out, kl))

    ref_out, ref_kl = reference_forward(x, params, design, chol_inv)

    assert out.shape == (B, output_dim)
    # log_softmax rows must exponentiate-sum to 1
    np.testing.assert_allclose(np.exp(np.asarray(out)).sum(axis=1), 1.0,
                               atol=1e-4)
    np.testing.assert_allclose(np.asarray(out), np.asarray(ref_out),
                               rtol=2e-3, atol=2e-3)
    np.testing.assert_allclose(float(kl), float(ref_kl), rtol=1e-5, atol=1e-5)
    assert np.isfinite(float(kl))
    print("KERNEL_OK")
</pallas_src>

<mosaic_0001>
module attributes {stable_mosaic.version = 11 : i64} {
  func.func @dtmgp_kernel(%arg0: i32, %arg1: memref<8x256xf32, #tpu.memory_space<vmem>>, %arg2: memref<8x256xf32, #tpu.memory_space<vmem>>, %arg3: memref<257x8xf32, #tpu.memory_space<vmem>>, %arg4: memref<257x8xf32, #tpu.memory_space<vmem>>, %arg5: memref<257x128xf32, #tpu.memory_space<vmem>>, %arg6: memref<8x128xf32, #tpu.memory_space<vmem>>) attributes {dimension_semantics = [#tpu.dimension_semantics<parallel>], iteration_bounds = array<i64: 1>, scalar_prefetch = 0 : i64, scratch_operands = 0 : i64, tpu.core_type = #tpu.core_type<tc>, window_params = [{transform_indices = @transform_0, window_bounds = array<i64: 8, 256>}, {pipeline_mode = #tpu.pipeline_mode<synchronous>, transform_indices = @transform_1, window_bounds = array<i64: 8, 256>}, {pipeline_mode = #tpu.pipeline_mode<synchronous>, transform_indices = @transform_2, window_bounds = array<i64: 257, 8>}, {pipeline_mode = #tpu.pipeline_mode<synchronous>, transform_indices = @transform_3, window_bounds = array<i64: 257, 8>}, {pipeline_mode = #tpu.pipeline_mode<synchronous>, transform_indices = @transform_4, window_bounds = array<i64: 257, 128>}, {transform_indices = @transform_5, window_bounds = array<i64: 8, 128>}]} {
    %c0 = arith.constant 0 : index
    %c0_0 = arith.constant 0 : index
    %0 = vector.load %arg1[%c0, %c0_0] : memref<8x256xf32, #tpu.memory_space<vmem>>, vector<8x256xf32>
    %c0_1 = arith.constant 0 : index
    %c0_2 = arith.constant 0 : index
    %1 = vector.load %arg2[%c0_1, %c0_2] : memref<8x256xf32, #tpu.memory_space<vmem>>, vector<8x256xf32>
    %c0_3 = arith.constant 0 : index
    %c0_4 = arith.constant 0 : index
    %2 = vector.load %arg3[%c0_3, %c0_4] : memref<257x8xf32, #tpu.memory_space<vmem>>, vector<257x8xf32>
    %c0_5 = arith.constant 0 : index
    %c0_6 = arith.constant 0 : index
    %3 = vector.load %arg4[%c0_5, %c0_6] : memref<257x8xf32, #tpu.memory_space<vmem>>, vector<257x8xf32>
    %c0_7 = arith.constant 0 : index
    %c0_8 = arith.constant 0 : index
    %4 = vector.load %arg5[%c0_7, %c0_8] : memref<257x128xf32, #tpu.memory_space<vmem>>, vector<257x128xf32>
    %5 = vector.extract_strided_slice %2 {offsets = [0, 0], sizes = [256, 8], strides = [1, 1]} : vector<257x8xf32> to vector<256x8xf32>
    %cst = arith.constant dense<0.000000e+00> : vector<8x8xf32>
    %6 = tpu.matmul %0, %5, %cst {dimension_numbers = #tpu.dot_dimension_numbers<[1], [0], [0], [1], [0, 0, 1, 1], [], []>} : vector<8x256xf32>, vector<256x8xf32>, vector<8x8xf32> -> vector<8x8xf32>
    %7 = vector.extract_strided_slice %2 {offsets = [256, 0], sizes = [1, 8], strides = [1, 1]} : vector<257x8xf32> to vector<1x8xf32>
    %8 = vector.broadcast %7 : vector<1x8xf32> to vector<8x8xf32>
    %9 = arith.addf %6, %8 : vector<8x8xf32>
    %cst_9 = arith.constant 0.000000e+00 : f32
    %10 = vector.broadcast %cst_9 : f32 to vector<8x8xf32>
    %11 = arith.maximumf %9, %10 : vector<8x8xf32>
    %12 = vector.shape_cast %11 : vector<8x8xf32> to vector<8x8x1xf32>
    %13 = vector.shape_cast %1 : vector<8x256xf32> to vector<1x8x256xf32>
    %14 = vector.broadcast %12 : vector<8x8x1xf32> to vector<8x8x256xf32>
    %15 = vector.broadcast %13 : vector<1x8x256xf32> to vector<8x8x256xf32>
    %16 = arith.subf %14, %15 : vector<8x8x256xf32>
    %17 = math.absf %16 : vector<8x8x256xf32>
    %cst_10 = arith.constant dense<0.000000e+00> : vector<8x256xf32>
    %18 = vector.multi_reduction <add>, %17, %cst_10 [1] : vector<8x8x256xf32> to vector<8x256xf32>
    %cst_11 = arith.constant 0.000000e+00 : f32
    %19 = vector.broadcast %cst_11 : f32 to vector<8x256xf32>
    %20 = arith.subf %19, %18 : vector<8x256xf32>
    %21 = math.exp %20 : vector<8x256xf32>
    %22 = vector.extract_strided_slice %3 {offsets = [0, 0], sizes = [256, 8], strides = [1, 1]} : vector<257x8xf32> to vector<256x8xf32>
    %cst_12 = arith.constant dense<0.000000e+00> : vector<8x8xf32>
    %23 = tpu.matmul %21, %22, %cst_12 {dimension_numbers = #tpu.dot_dimension_numbers<[1], [0], [0], [1], [0, 0, 1, 1], [], []>} : vector<8x256xf32>, vector<256x8xf32>, vector<8x8xf32> -> vector<8x8xf32>
    %24 = vector.extract_strided_slice %3 {offsets = [256, 0], sizes = [1, 8], strides = [1, 1]} : vector<257x8xf32> to vector<1x8xf32>
    %25 = vector.broadcast %24 : vector<1x8xf32> to vector<8x8xf32>
    %26 = arith.addf %23, %25 : vector<8x8xf32>
    %27 = vector.shape_cast %26 : vector<8x8xf32> to vector<8x8x1xf32>
    %28 = vector.shape_cast %1 : vector<8x256xf32> to vector<1x8x256xf32>
    %29 = vector.broadcast %27 : vector<8x8x1xf32> to vector<8x8x256xf32>
    %30 = vector.broadcast %28 : vector<1x8x256xf32> to vector<8x8x256xf32>
    %31 = arith.subf %29, %30 : vector<8x8x256xf32>
    %32 = math.absf %31 : vector<8x8x256xf32>
    %cst_13 = arith.constant dense<0.000000e+00> : vector<8x256xf32>
    %33 = vector.multi_reduction <add>, %32, %cst_13 [1] : vector<8x8x256xf32> to vector<8x256xf32>
    %cst_14 = arith.constant 0.000000e+00 : f32
    %34 = vector.broadcast %cst_14 : f32 to vector<8x256xf32>
    %35 = arith.subf %34, %33 : vector<8x256xf32>
    %36 = math.exp %35 : vector<8x256xf32>
    %37 = vector.extract_strided_slice %4 {offsets = [0, 0], sizes = [256, 128], strides = [1, 1]} : vector<257x128xf32> to vector<256x128xf32>
    %cst_15 = arith.constant dense<0.000000e+00> : vector<8x128xf32>
    %38 = tpu.matmul %36, %37, %cst_15 {dimension_numbers = #tpu.dot_dimension_numbers<[1], [0], [0], [1], [0, 0, 1, 1], [], []>} : vector<8x256xf32>, vector<256x128xf32>, vector<8x128xf32> -> vector<8x128xf32>
    %39 = vector.extract_strided_slice %4 {offsets = [256, 0], sizes = [1, 128], strides = [1, 1]} : vector<257x128xf32> to vector<1x128xf32>
    %40 = vector.broadcast %39 : vector<1x128xf32> to vector<8x128xf32>
    %41 = arith.addf %38, %40 : vector<8x128xf32>
    %cst_16 = arith.constant dense<0xFF800000> : vector<8xf32>
    %42 = vector.multi_reduction <maximumf>, %41, %cst_16 [1] : vector<8x128xf32> to vector<8xf32>
    %43 = vector.shape_cast %42 : vector<8xf32> to vector<8x1xf32>
    %44 = vector.broadcast %43 : vector<8x1xf32> to vector<8x128xf32>
    %45 = arith.subf %41, %44 : vector<8x128xf32>
    %46 = math.exp %45 : vector<8x128xf32>
    %cst_17 = arith.constant dense<0.000000e+00> : vector<8xf32>
    %47 = vector.multi_reduction <add>, %46, %cst_17 [1] : vector<8x128xf32> to vector<8xf32>
    %48 = vector.shape_cast %47 : vector<8xf32> to vector<8x1xf32>
    %49 = math.log %48 : vector<8x1xf32>
    %50 = vector.broadcast %49 : vector<8x1xf32> to vector<8x128xf32>
    %51 = arith.subf %45, %50 : vector<8x128xf32>
    %c0_18 = arith.constant 0 : index
    %c0_19 = arith.constant 0 : index
    %52 = vector.load %arg6[%c0_18, %c0_19] : memref<8x128xf32, #tpu.memory_space<vmem>>, vector<8x128xf32>
    tpu.vector_store %arg6[%c0_18, %c0_19], %51 {strides = array<i32>} : memref<8x128xf32, #tpu.memory_space<vmem>>, vector<8x128xf32>,
    return
  }
  func.func @transform_0(%arg0: i32) -> (i32, i32) {
    %c0_i32 = arith.constant 0 : i32
    %c0_i32_0 = arith.constant 0 : i32
    return %arg0, %c0_i32 : i32, i32
  }
  func.func @transform_1(%arg0: i32) -> (i32, i32) {
    %c0_i32 = arith.constant 0 : i32
    %c0_i32_0 = arith.constant 0 : i32
    %c0_i32_1 = arith.constant 0 : i32
    return %c0_i32, %c0_i32_0 : i32, i32
  }
  func.func @transform_2(%arg0: i32) -> (i32, i32) {
    %c0_i32 = arith.constant 0 : i32
    %c0_i32_0 = arith.constant 0 : i32
    %c0_i32_1 = arith.constant 0 : i32
    return %c0_i32, %c0_i32_0 : i32, i32
  }
  func.func @transform_3(%arg0: i32) -> (i32, i32) {
    %c0_i32 = arith.constant 0 : i32
    %c0_i32_0 = arith.constant 0 : i32
    %c0_i32_1 = arith.constant 0 : i32
    return %c0_i32, %c0_i32_0 : i32, i32
  }
  func.func @transform_4(%arg0: i32) -> (i32, i32) {
    %c0_i32 = arith.constant 0 : i32
    %c0_i32_0 = arith.constant 0 : i32
    %c0_i32_1 = arith.constant 0 : i32
    return %c0_i32, %c0_i32_0 : i32, i32
  }
  func.func @transform_5(%arg0: i32) -> (i32, i32) {
    %c0_i32 = arith.constant 0 : i32
    %c0_i32_0 = arith.constant 0 : i32
    return %arg0, %c0_i32 : i32, i32
  }
}

</mosaic_0001>

<bundles_post_ra>
// kernel: dtmgp_forward.1
= control target key start
LH: loop header
LB: loop body
LE: loop exit
PB: predicated region body
PF: predicated region fallthrough
CT: control target
= control target key end

     0   :  { %v198_v50 = vlaneseq  ;;  %vm450_vm0 = vcmask 1041409   ;;  %vm452_vm1 = vcmask 1042434   ;;  %vm454_vm2 = vcmask 1043459   ;;  %s1643_s2 = inlined_call_operand.vmem [shape: f32[257,8], index: 2, kind: input, shape index: {}]   ;;  %s1644_s0 = inlined_call_operand.vmem [shape: f32[8,256], index: 0, kind: input, shape index: {}]   ;;  %s1645_s3 = inlined_call_operand.vmem [shape: f32[257,8], index: 3, kind: input, shape index: {}]   ;;  %s1646_s1 = inlined_call_operand.vmem [shape: f32[8,256], index: 1, kind: input, shape index: {}]   ;;  %s1647_s4 = inlined_call_operand.vmem [shape: f32[257,128], index: 4, kind: input, shape index: {}]   ;;  %s1648_s5 = inlined_call_operand.vmem [shape: f32[8,128], index: 5, kind: output, shape index: {}]  }
   0x1   :  { %v40_v0 = vld [vmem:[%s1643_s2 + $0x80] sm:$0xff]  ;;  %v41_v1 = vld [vmem:[%s1643_s2 + $0x88] sm:$0xff]  ;;  %v42_v5 = vld [vmem:[%s1643_s2 + $0x90] sm:$0xff]  ;;  %vm456_vm3 = vcmask 1044484   ;;  %vm458_vm4 = vcmask 1045509   ;;  %vm460_vm5 = vcmask 1046534  }
   0x2   :  { %v24_v2 = vld [vmem:[%s1643_s2] sm:$0xff]  ;;  %v1004_v3 = vpack.c.bf16 %v41_v1, %v40_v0  ;;  %v25_v4 = vld [vmem:[%s1643_s2 + $0x8] sm:$0xff]  ;;  %v43_v6 = vld [vmem:[%s1643_s2 + $0x98] sm:$0xff]  ;;  %v1300_v52 = vshrl.u32 %v198_v50, 7  ;;  %vm462_vm6 = vcmask 1047559  }
   0x3   :  { %v1006_v7 = vpack.c.bf16 %v25_v4, %v24_v2  ;;  %v1008_v8 = vpack.c.bf16 %v43_v6, %v42_v5  ;;  %v26_v9 = vld [vmem:[%s1643_s2 + $0x10] sm:$0xff]  ;;  %v27_v10 = vld [vmem:[%s1643_s2 + $0x18] sm:$0xff]  ;;  %v44_v11 = vld [vmem:[%s1643_s2 + $0xa0] sm:$0xff] }
   0x4   :  { %1005 = vmatprep.subr.bf16.mxu0 %v1004_v3  ;;  %v45_v12 = vld [vmem:[%s1643_s2 + $0xa8] sm:$0xff]  ;;  %v1010_v13 = vpack.c.bf16 %v27_v10, %v26_v9  ;;  %v28_v15 = vld [vmem:[%s1643_s2 + $0x20] sm:$0xff]  ;;  %v46_v17 = vld [vmem:[%s1643_s2 + $0xb0] sm:$0xff]  ;;  %v214_v57 = vsub.s32 2, %v1300_v52  ;;  %v200_v58 = vsub.s32 0, %v1300_v52  ;;  %v221_v62 = vsub.s32 3, %v1300_v52 }
   0x5   :  { %1007 = vmatpush3.bf16.msra.mxu0 %v1006_v7  ;;  %v1012_v14 = vpack.c.bf16 %v45_v12, %v44_v11  ;;  %v29_v16 = vld [vmem:[%s1643_s2 + $0x28] sm:$0xff]  ;;  %v47_v18 = vld [vmem:[%s1643_s2 + $0xb8] sm:$0xff]  ;;  %v30_v21 = vld [vmem:[%s1643_s2 + $0x30] sm:$0xff]  ;;  %v207_v63 = vsub.s32 1, %v1300_v52  ;;  %v235_v2 = vsub.s32 5, %v1300_v52  ;;  %v228_v3 = vsub.s32 4, %v1300_v52 }
   0x6   :  { %1009 = vmatprep.subr.bf16.mxu0 %v1008_v8  ;;  %v1014_v19 = vpack.c.bf16 %v29_v16, %v28_v15  ;;  %v1016_v20 = vpack.c.bf16 %v47_v18, %v46_v17  ;;  %v31_v22 = vld [vmem:[%s1643_s2 + $0x38] sm:$0xff]  ;;  %v48_v23 = vld [vmem:[%s1643_s2 + $0xc0] sm:$0xff]  ;;  %v49_v24 = vld [vmem:[%s1643_s2 + $0xc8] sm:$0xff]  ;;  %v249_v6 = vsub.s32 7, %v1300_v52  ;;  %v242_v7 = vsub.s32 6, %v1300_v52 }
   0x7   :  { %v21_v25 = vld [vmem:[%s1644_s0 + $0x8] sm:$0xff]  ;;  %v1018_v26 = vpack.c.bf16 %v31_v22, %v30_v21  ;;  %v1020_v27 = vpack.c.bf16 %v49_v24, %v48_v23  ;;  %v32_v28 = vld [vmem:[%s1643_s2 + $0x40] sm:$0xff]  ;;  %v50_v30 = vld [vmem:[%s1643_s2 + $0xd0] sm:$0xff] }
   0x8   :  { %191 = vmatprep.mubr.f32.mxu0 %v21_v25  ;;  %v33_v29 = vld [vmem:[%s1643_s2 + $0x48] sm:$0xff]  ;;  %v51_v31 = vld [vmem:[%s1643_s2 + $0xd8] sm:$0xff]  ;;  %v34_v34 = vld [vmem:[%s1643_s2 + $0x50] sm:$0xff] }
   0x9   :  { %1011 = vmatpush3.bf16.msra.mxu0 %v1010_v13  ;;  %v1022_v32 = vpack.c.bf16 %v33_v29, %v32_v28  ;;  %v1024_v33 = vpack.c.bf16 %v51_v31, %v50_v30  ;;  %v35_v35 = vld [vmem:[%s1643_s2 + $0x58] sm:$0xff]  ;;  %v52_v36 = vld [vmem:[%s1643_s2 + $0xe0] sm:$0xff]  ;;  %v53_v37 = vld [vmem:[%s1643_s2 + $0xe8] sm:$0xff] }
   0xa   :  { %1013 = vmatprep.subr.bf16.mxu0 %v1012_v14  ;;  %v1026_v38 = vpack.c.bf16 %v35_v35, %v34_v34  ;;  %v1028_v39 = vpack.c.bf16 %v53_v37, %v52_v36  ;;  %v36_v40 = vld [vmem:[%s1643_s2 + $0x60] sm:$0xff]  ;;  %v37_v41 = vld [vmem:[%s1643_s2 + $0x68] sm:$0xff]  ;;  %v54_v42 = vld [vmem:[%s1643_s2 + $0xf0] sm:$0xff] }
   0xb   :  { %v55_v43 = vld [vmem:[%s1643_s2 + $0xf8] sm:$0xff]  ;;  %v1030_v44 = vpack.c.bf16 %v37_v41, %v36_v40  ;;  %v38_v46 = vld [vmem:[%s1643_s2 + $0x70] sm:$0xff]  ;;  %v20_v49 = vld [vmem:[%s1644_s0] sm:$0xff] }
   0xc   :  { %v1032_v45 = vpack.c.bf16 %v55_v43, %v54_v42  ;;  %v39_v47 = vld [vmem:[%s1643_s2 + $0x78] sm:$0xff]  ;;  %v896_v53 = vld [vmem:[%s1643_s2 + $0x100] ss:$0 sm:$0xff]  ;;  %v74_v11 = vld [vmem:[%s1645_s3 + $0x88] sm:$0xff] }
   0xd   :  { %1015 = vmatpush3.bf16.msra.mxu0 %v1014_v19  ;;  %v1034_v48 = vpack.c.bf16 %v39_v47, %v38_v46  ;;  %v73_v10 = vld [vmem:[%s1645_s3 + $0x80] sm:$0xff]  ;;  %v58_v14 = vld [vmem:[%s1645_s3 + $0x8] sm:$0xff]  ;;  %v75_v16 = vld [vmem:[%s1645_s3 + $0x90] sm:$0xff] }
   0xe   :  { %1017 = vmatprep.subr.bf16.mxu0 %v1016_v20  ;;  %v1036_v12 = vpack.c.bf16 %v74_v11, %v73_v10  ;;  %v57_v13 = vld [vmem:[%s1645_s3] sm:$0xff]  ;;  %v76_v17 = vld [vmem:[%s1645_s3 + $0x98] sm:$0xff]  ;;  %v59_v19 = vld [vmem:[%s1645_s3 + $0x10] sm:$0xff] }
   0xf   :  { %v1038_v15 = vpack.c.bf16 %v58_v14, %v57_v13  ;;  %v1040_v18 = vpack.c.bf16 %v76_v17, %v75_v16  ;;  %v60_v20 = vld [vmem:[%s1645_s3 + $0x18] sm:$0xff]  ;;  %v77_v22 = vld [vmem:[%s1645_s3 + $0xa0] sm:$0xff]  ;;  %v78_v23 = vld [vmem:[%s1645_s3 + $0xa8] sm:$0xff] }
  0x10   :  { %1037 = vmatprep.subr.bf16.mxu1 %v1036_v12  ;;  %v1042_v21 = vpack.c.bf16 %v60_v20, %v59_v19  ;;  %v1044_v24 = vpack.c.bf16 %v78_v23, %v77_v22  ;;  %v61_v25 = vld [vmem:[%s1645_s3 + $0x20] sm:$0xff]  ;;  %v79_v28 = vld [vmem:[%s1645_s3 + $0xb0] sm:$0xff]  ;;  %v80_v29 = vld [vmem:[%s1645_s3 + $0xb8] sm:$0xff] }
  0x11   :  { %1019 = vmatpush3.bf16.msra.mxu0 %v1018_v26  ;;  %1039 = vmatpush3.bf16.msra.mxu1 %v1038_v15  ;;  %v62_v26 = vld [vmem:[%s1645_s3 + $0x28] sm:$0xff]  ;;  %v1048_v30 = vpack.c.bf16 %v80_v29, %v79_v28  ;;  %v63_v31 = vld [vmem:[%s1645_s3 + $0x30] sm:$0xff]  ;;  %v81_v34 = vld [vmem:[%s1645_s3 + $0xc0] sm:$0xff] }
  0x12   :  { %1021 = vmatprep.subr.bf16.mxu0 %v1020_v27  ;;  %1041 = vmatprep.subr.bf16.mxu1 %v1040_v18  ;;  %v1046_v27 = vpack.c.bf16 %v62_v26, %v61_v25  ;;  %v82_v35 = vld [vmem:[%s1645_s3 + $0xc8] sm:$0xff]  ;;  %v65_v37 = vld [vmem:[%s1645_s3 + $0x40] sm:$0xff]  ;;  %v83_v40 = vld [vmem:[%s1645_s3 + $0xd0] sm:$0xff] }
  0x13   :  { %v1052_v36 = vpack.c.bf16 %v82_v35, %v81_v34  ;;  %v84_v41 = vld [vmem:[%s1645_s3 + $0xd8] sm:$0xff]  ;;  %v67_v43 = vld [vmem:[%s1645_s3 + $0x50] sm:$0xff]  ;;  %v86_v47 = vld [vmem:[%s1645_s3 + $0xe8] sm:$0xff] }
  0x14   :  { %v1056_v42 = vpack.c.bf16 %v84_v41, %v83_v40  ;;  %v91_v52 = vld [vmem:[%s1647_s4 + $0x8] sm:$0xff] }
  0x15   :  { %1023 = vmatpush3.bf16.msra.mxu0 %v1022_v32  ;;  %1043 = vmatpush3.bf16.msra.mxu1 %v1042_v21  ;;  %v64_v32 = vld [vmem:[%s1645_s3 + $0x38] sm:$0xff] }
  0x16   :  { %1025 = vmatprep.subr.bf16.mxu0 %v1024_v33  ;;  %1045 = vmatprep.subr.bf16.mxu1 %v1044_v24  ;;  %v1050_v33 = vpack.c.bf16 %v64_v32, %v63_v31 }
  0x19   :  { %1027 = vmatpush3.bf16.msra.mxu0 %v1026_v38  ;;  %1047 = vmatpush3.bf16.msra.mxu1 %v1046_v27  ;;  %v66_v38 = vld [vmem:[%s1645_s3 + $0x48] sm:$0xff] }
  0x1a   :  { %1029 = vmatprep.subr.bf16.mxu0 %v1028_v39  ;;  %1049 = vmatprep.subr.bf16.mxu1 %v1048_v30  ;;  %v1054_v39 = vpack.c.bf16 %v66_v38, %v65_v37 }
  0x1d   :  { %1031 = vmatpush3.bf16.msra.mxu0 %v1030_v44  ;;  %1051 = vmatpush3.bf16.msra.mxu1 %v1050_v33  ;;  %v68_v44 = vld [vmem:[%s1645_s3 + $0x58] sm:$0xff] }
  0x1e   :  { %1033 = vmatprep.subr.bf16.mxu0 %v1032_v45  ;;  %1053 = vmatprep.subr.bf16.mxu1 %v1052_v36  ;;  %v85_v45 = vld [vmem:[%s1645_s3 + $0xe0] sm:$0xff]  ;;  %v1058_v46 = vpack.c.bf16 %v68_v44, %v67_v43 }
  0x1f   :  { %v1060_v50 = vpack.c.bf16 %v86_v47, %v85_v45 }
  0x21   :  { %1035 = vmatpush3.bf16.msra.mxu0 %v1034_v48  ;;  %1055 = vmatpush3.bf16.msra.mxu1 %v1054_v39  ;;  %v69_v48 = vld [vmem:[%s1645_s3 + $0x60] sm:$0xff] }
  0x22   :  { %1057 = vmatprep.subr.bf16.mxu1 %v1056_v42 }
  0x24   :  { %192 = vmatmul.mubr.f32.vlgmr.msra.gmra.mrb[0].mxu0 %v20_v49  ;;  %v70_v49 = vld [vmem:[%s1645_s3 + $0x68] sm:$0xff] }
  0x25   :  { %1059 = vmatpush3.bf16.msra.mxu1 %v1058_v46 }
  0x26   :  { %1061 = vmatprep.subr.bf16.mxu1 %v1060_v50 }
  0xf7   :  { %v931_v51 = vpop.f32.mrb[0].mxu0 }
  0xf8   :  { %v932_v54 = vpop.f32.mrb[1].mxu0 }
  0xf9   :  { %v933_v55 = vadd.f32 %v932_v54, %v931_v51  ;;  %v87_v51 = vld [vmem:[%s1645_s3 + $0xf0] sm:$0xff]  ;;  %v1062_v54 = vpack.c.bf16 %v70_v49, %v69_v48 }
  0xfb   :  { %v194_v56 = vadd.f32 %v933_v55, %v896_v53  ;;  %v88_v53 = vld [vmem:[%s1645_s3 + $0xf8] sm:$0xff]  ;;  %1063 = vmatpush3.bf16.msra.mxu1 %v1062_v54 }
  0xfc   :  { %v1064_v55 = vpack.c.bf16 %v88_v53, %v87_v51 }
  0xfd   :  { %v197_v59 = vmax.f32 %v194_v56, 0.0  ;;  %v71_v56 = vld [vmem:[%s1645_s3 + $0x70] sm:$0xff] }
  0xfe   :  { %1065 = vmatprep.subr.bf16.mxu1 %v1064_v55 }
  0xff   :  { %v215_v60 = vrot.slane %v197_v59, %v214_v57  ;;  %v201_v61 = vrot.slane %v197_v59, %v200_v58  ;;  %v222_v0 = vrot.slane %v197_v59, %v221_v62  ;;  %v208_v1 = vrot.slane %v197_v59, %v207_v63 }
 0x100   :  { %v236_v4 = vrot.slane %v197_v59, %v235_v2  ;;  %v229_v5 = vrot.slane %v197_v59, %v228_v3  ;;  %v250_v8 = vrot.slane %v197_v59, %v249_v6  ;;  %v243_v9 = vrot.slane %v197_v59, %v242_v7  ;;  %v72_v59 = vld [vmem:[%s1645_s3 + $0x78] sm:$0xff] }
 0x101   :  { %217 = vbcast.lane.b32.xlu1 %v215_v60, 256  ;;  %203 = vbcast.lane.b32.xlu0 %v201_v61, 256  ;;  %v1066_v60 = vpack.c.bf16 %v72_v59, %v71_v56  ;;  %v1428_v61 = vld [vmem:[%s1646_s1] sm:$0xff] }
 0x103   :  { %1067 = vmatpush3.bf16.msra.mxu1 %v1066_v60 }
 0x105   :  { %224 = vbcast.lane.b32.xlu1 %v222_v0, 256  ;;  %210 = vbcast.lane.b32.xlu0 %v208_v1, 256  ;;  %v1433_v0 = vld [vmem:[%s1646_s1 + $0x8] sm:$0xff] }
 0x109   :  { %238 = vbcast.lane.b32.xlu1 %v236_v4, 256  ;;  %231 = vbcast.lane.b32.xlu0 %v229_v5, 256 }
 0x10d   :  { %252 = vbcast.lane.b32.xlu1 %v250_v8, 256  ;;  %245 = vbcast.lane.b32.xlu0 %v243_v9, 256 }
 0x173   :  { %v218_v1 = vpop.permute.xlu1 %217  ;;  %v204_v4 = vpop.permute.xlu0 %203 }
 0x174   :  { %v258_v5 = vsub.f32 %v218_v1, %v1428_v61  ;;  %v259_v8 = vsub.f32 %v218_v1, %v1433_v0  ;;  %v254_v9 = vsub.f32 %v204_v4, %v1428_v61  ;;  %v255_v10 = vsub.f32 %v204_v4, %v1433_v0 }
 0x176   :  { %v274_v11 = vand.u32 2147483647, %v258_v5  ;;  %v275_v12 = vand.u32 2147483647, %v259_v8  ;;  %v270_v13 = vand.u32 2147483647, %v254_v9 }
 0x177   :  { %v271_v14 = vand.u32 2147483647, %v255_v10  ;;  %v225_v15 = vpop.permute.xlu1 %224  ;;  %v211_v16 = vpop.permute.xlu0 %210 }
 0x178   :  { %v310_v17 = vrot.slane %v274_v11, 4  ;;  %v316_v18 = vrot.slane %v275_v12, 4  ;;  %v286_v19 = vrot.slane %v270_v13, 4  ;;  %v260_v20 = vsub.f32 %v225_v15, %v1428_v61 }
 0x179   :  { %v292_v21 = vrot.slane %v271_v14, 4  ;;  %v261_v22 = vsub.f32 %v225_v15, %v1433_v0  ;;  %v256_v23 = vsub.f32 %v211_v16, %v1428_v61  ;;  %v257_v24 = vsub.f32 %v211_v16, %v1433_v0 }
 0x17a   :  { %v311_v25 = vadd.f32 %v310_v17, %v274_v11  ;;  %v317_v26 = vadd.f32 %v316_v18, %v275_v12  ;;  %v287_v27 = vadd.f32 %v286_v19, %v270_v13  ;;  %v276_v28 = vand.u32 2147483647, %v260_v20 }
 0x17b   :  { %v293_v29 = vadd.f32 %v292_v21, %v271_v14  ;;  %v277_v30 = vand.u32 2147483647, %v261_v22  ;;  %v272_v31 = vand.u32 2147483647, %v256_v23  ;;  %v273_v32 = vand.u32 2147483647, %v257_v24  ;;  %v239_v16 = vpop.permute.xlu1 %238 }
 0x17c   :  { %v312_v33 = vrot.slane %v311_v25, 2  ;;  %v318_v34 = vrot.slane %v317_v26, 2  ;;  %v288_v35 = vrot.slane %v287_v27, 2  ;;  %v322_v36 = vrot.slane %v276_v28, 4 }
 0x17d   :  { %v294_v37 = vrot.slane %v293_v29, 2  ;;  %v328_v38 = vrot.slane %v277_v30, 4  ;;  %v298_v39 = vrot.slane %v272_v31, 4  ;;  %v304_v40 = vrot.slane %v273_v32, 4 }
 0x17e   :  { %v313_v41 = vadd.f32 %v312_v33, %v311_v25  ;;  %v319_v42 = vadd.f32 %v318_v34, %v317_v26  ;;  %v289_v43 = vadd.f32 %v288_v35, %v287_v27  ;;  %v323_v44 = vadd.f32 %v322_v36, %v276_v28  ;;  %v232_v28 = vpop.permute.xlu0 %231 }
 0x17f   :  { %v295_v45 = vadd.f32 %v294_v37, %v293_v29  ;;  %v329_v46 = vadd.f32 %v328_v38, %v277_v30  ;;  %v299_v47 = vadd.f32 %v298_v39, %v272_v31  ;;  %v305_v48 = vadd.f32 %v304_v40, %v273_v32  ;;  %v253_v37 = vpop.permute.xlu1 %252 }
 0x180   :  { %v314_v49 = vrot.slane %v313_v41, 1  ;;  %v320_v50 = vrot.slane %v319_v42, 1  ;;  %v290_v51 = vrot.slane %v289_v43, 1  ;;  %v324_v53 = vrot.slane %v323_v44, 2 }
 0x181   :  { %v296_v54 = vrot.slane %v295_v45, 1  ;;  %v330_v55 = vrot.slane %v329_v46, 2  ;;  %v300_v56 = vrot.slane %v299_v47, 2  ;;  %v306_v59 = vrot.slane %v305_v48, 2 }
 0x182   :  { %v315_v60 = vadd.f32 %v314_v49, %v313_v41  ;;  %v321_v1 = vadd.f32 %v320_v50, %v319_v42  ;;  %v291_v4 = vadd.f32 %v290_v51, %v289_v43  ;;  %v325_v5 = vadd.f32 %v324_v53, %v323_v44 }
 0x183   :  { %v297_v8 = vadd.f32 %v296_v54, %v295_v45  ;;  %v331_v9 = vadd.f32 %v330_v55, %v329_v46  ;;  %v301_v10 = vadd.f32 %v300_v56, %v299_v47  ;;  %v307_v11 = vadd.f32 %v306_v59, %v305_v48  ;;  %v246_v48 = vpop.permute.xlu0 %245 }
 0x184   :  { %v386_v12 = vsub.f32 0.0, %v315_v60  ;;  %v387_v13 = vsub.f32 0.0, %v321_v1  ;;  %v382_v14 = vsub.f32 0.0, %v291_v4  ;;  %v326_v15 = vrot.slane %v325_v5, 1 }
 0x185   :  { %v383_v17 = vsub.f32 0.0, %v297_v8  ;;  %v332_v18 = vrot.slane %v331_v9, 1  ;;  %v302_v19 = vrot.slane %v301_v10, 1  ;;  %v308_v20 = vrot.slane %v307_v11, 1 }
 0x186   :  { %v406_v21 = vmul.f32 1.442695, %v386_v12  ;;  %v408_v22 = vmul.f32 1.442695, %v387_v13  ;;  %v327_v23 = vadd.f32 %v326_v15, %v325_v5  ;;  %v398_v24 = vmul.f32 1.442695, %v382_v14 }
 0x187   :  { %v1443_v25 = vadd.f32 %v332_v18, %v331_v9  ;;  %v303_v26 = vadd.f32 %v302_v19, %v301_v10  ;;  %v309_v27 = vadd.f32 %v308_v20, %v307_v11  ;;  %v264_v30 = vsub.f32 %v239_v16, %v1428_v61 }
 0x188   :  { %v388_v29 = vsub.f32 0.0, %v327_v23  ;;  %v265_v31 = vsub.f32 %v239_v16, %v1433_v0  ;;  %1100 = vpow2.f32 %v406_v21  ;;  %v400_v32 = vmul.f32 1.442695, %v383_v17 }
 0x189   :  { %v384_v33 = vsub.f32 0.0, %v303_v26  ;;  %v385_v34 = vsub.f32 0.0, %v309_v27  ;;  %1102 = vpow2.f32 %v408_v22  ;;  %v280_v35 = vand.u32 2147483647, %v264_v30 }
 0x18a   :  { %v281_v36 = vand.u32 2147483647, %v265_v31  ;;  %1104 = vpow2.f32 %v398_v24  ;;  %v389_v38 = vsub.f32 0.0, %v1443_v25  ;;  %v1448_v41 = vmul.f32 1.442695, %v388_v29 }
 0x18b   :  { %v402_v39 = vmul.f32 1.442695, %v384_v33  ;;  %v404_v40 = vmul.f32 1.442695, %v385_v34  ;;  %v346_v42 = vrot.slane %v280_v35, 4  ;;  %v262_v44 = vsub.f32 %v232_v28, %v1428_v61 }
 0x18c   :  { %v352_v43 = vrot.slane %v281_v36, 4  ;;  %1106 = vpow2.f32 %v400_v32  ;;  %v263_v45 = vsub.f32 %v232_v28, %v1433_v0  ;;  %v268_v46 = vsub.f32 %v253_v37, %v1428_v61 }
 0x18d   :  { %v269_v47 = vsub.f32 %v253_v37, %v1433_v0  ;;  %1108 = vpow2.f32 %v402_v39  ;;  %v347_v49 = vadd.f32 %v346_v42, %v280_v35  ;;  %v278_v51 = vand.u32 2147483647, %v262_v44 }
 0x18e   :  { %v353_v50 = vadd.f32 %v352_v43, %v281_v36  ;;  %1110 = vpow2.f32 %v404_v40  ;;  %v279_v53 = vand.u32 2147483647, %v263_v45  ;;  %v284_v54 = vand.u32 2147483647, %v268_v46 }
 0x18f   :  { %v285_v55 = vand.u32 2147483647, %v269_v47  ;;  %v348_v56 = vrot.slane %v347_v49, 2  ;;  %v334_v60 = vrot.slane %v278_v51, 4  ;;  %v266_v1 = vsub.f32 %v246_v48, %v1428_v61 }
 0x190   :  { %v354_v59 = vrot.slane %v353_v50, 2  ;;  %v340_v4 = vrot.slane %v279_v53, 4  ;;  %v370_v5 = vrot.slane %v284_v54, 4  ;;  %v267_v9 = vsub.f32 %v246_v48, %v1433_v0 }
 0x191   :  { %v376_v8 = vrot.slane %v285_v55, 4  ;;  %v349_v10 = vadd.f32 %v348_v56, %v347_v49  ;;  %v335_v12 = vadd.f32 %v334_v60, %v278_v51  ;;  %v282_v13 = vand.u32 2147483647, %v266_v1 }
 0x192   :  { %v355_v11 = vadd.f32 %v354_v59, %v353_v50  ;;  %v1456_v14 = vpop.eup %1100  ;;  %v341_v15 = vadd.f32 %v340_v4, %v279_v53  ;;  %v371_v16 = vadd.f32 %v370_v5, %v284_v54  ;;  %v283_v18 = vand.u32 2147483647, %v267_v9 }
 0x193   :  { %v377_v17 = vadd.f32 %v376_v8, %v285_v55  ;;  %v1458_v19 = vpop.eup %1102  ;;  %v350_v20 = vrot.slane %v349_v10, 1  ;;  %v336_v22 = vrot.slane %v335_v12, 2  ;;  %v358_v23 = vrot.slane %v282_v13, 4 }
 0x194   :  { %v356_v21 = vrot.slane %v355_v11, 1  ;;  %v1105_v24 = vpop.eup %1104  ;;  %v342_v25 = vrot.slane %v341_v15, 2  ;;  %v372_v26 = vrot.slane %v371_v16, 2  ;;  %v364_v28 = vrot.slane %v283_v18, 4 }
 0x195   :  { %v378_v27 = vrot.slane %v377_v17, 2  ;;  %v351_v29 = vadd.f32 %v350_v20, %v349_v10  ;;  %v337_v31 = vadd.f32 %v336_v22, %v335_v12  ;;  %v359_v32 = vadd.f32 %v358_v23, %v282_v13 }
 0x196   :  { %v357_v30 = vadd.f32 %v356_v21, %v355_v11  ;;  %v1107_v33 = vpop.eup %1106  ;;  %v343_v34 = vadd.f32 %v342_v25, %v341_v15  ;;  %v373_v35 = vadd.f32 %v372_v26, %v371_v16  ;;  %v365_v37 = vadd.f32 %v364_v28, %v283_v18 }
 0x197   :  { %v379_v36 = vadd.f32 %v378_v27, %v377_v17  ;;  %v1109_v39 = vpop.eup %1108  ;;  %v412_v40 = vmul.f32 1.442695, %v389_v38  ;;  %v392_v42 = vsub.f32 0.0, %v351_v29  ;;  %v338_v43 = vrot.slane %v337_v31, 1 }
 0x198   :  { %v360_v44 = vrot.slane %v359_v32, 2  ;;  %v1111_v45 = vpop.eup %1110  ;;  %v344_v46 = vrot.slane %v343_v34, 1  ;;  %v374_v47 = vrot.slane %v373_v35, 1  ;;  %v366_v49 = vrot.slane %v365_v37, 2 }
 0x199   :  { %v380_v48 = vrot.slane %v379_v36, 1  ;;  %v393_v50 = vsub.f32 0.0, %v357_v30  ;;  %v418_v51 = vmul.f32 1.442695, %v392_v42  ;;  %v339_v53 = vadd.f32 %v338_v43, %v337_v31 }
 0x19a   :  { %v361_v54 = vadd.f32 %v360_v44, %v359_v32  ;;  %v345_v55 = vadd.f32 %v344_v46, %v343_v34  ;;  %v375_v56 = vadd.f32 %v374_v47, %v373_v35  ;;  %v367_v60 = vadd.f32 %v366_v49, %v365_v37  ;;  %v897_v47 = vld [vmem:[%s1645_s3 + $0x100] ss:$0 sm:$0xff] }
 0x19b   :  { %v381_v59 = vadd.f32 %v380_v48, %v379_v36  ;;  %1112 = vpow2.f32 %v1448_v41  ;;  %v390_v1 = vsub.f32 0.0, %v339_v53  ;;  %v420_v9 = vmul.f32 1.442695, %v393_v50 }
 0x19c   :  { %v362_v38 = vrot.slane %v361_v54, 1  ;;  %1114 = vpow2.f32 %v412_v40  ;;  %v391_v4 = vsub.f32 0.0, %v345_v55  ;;  %v396_v5 = vsub.f32 0.0, %v375_v56 }
 0x19d   :  { %v397_v8 = vsub.f32 0.0, %v381_v59  ;;  %v414_v10 = vmul.f32 1.442695, %v390_v1  ;;  %v368_v12 = vrot.slane %v367_v60, 1  ;;  %1116 = vpow2.f32 %v418_v51 }
 0x19e   :  { %v363_v11 = vadd.f32 %v362_v38, %v361_v54  ;;  %v416_v13 = vmul.f32 1.442695, %v391_v4  ;;  %v426_v15 = vmul.f32 1.442695, %v396_v5  ;;  %v451_v21 = vsel %vm450_vm0, %v1109_v39, %v1105_v24  ;;  %v92_v38 = vld [vmem:[%s1647_s4 + $0x10] sm:$0xff]  ;;  %v93_v4 = vld [vmem:[%s1647_s4 + $0x18] sm:$0xff] }
 0x19f   :  { %1118 = vpow2.f32 %v414_v10  ;;  %v369_v16 = vadd.f32 %v368_v12, %v367_v60  ;;  %v428_v18 = vmul.f32 1.442695, %v397_v8  ;;  %v464_v23 = vsel %vm450_vm0, %v1111_v45, %v1107_v33  ;;  %v109_v60 = vld [vmem:[%s1647_s4 + $0x98] sm:$0xff]  ;;  %v110_v8 = vld [vmem:[%s1647_s4 + $0xa0] sm:$0xff]  ;;  %v95_v12 = vld [vmem:[%s1647_s4 + $0x28] sm:$0xff] }
 0x1a0   :  { %v394_v17 = vsub.f32 0.0, %v363_v11  ;;  %1120 = vpow2.f32 %v416_v13  ;;  %v453_v25 = vsel %vm452_vm1, %v1456_v14, %v451_v21  ;;  %v465_v28 = vsel %vm452_vm1, %v1458_v19, %v464_v23  ;;  %v94_v11 = vld [vmem:[%s1647_s4 + $0x20] sm:$0xff] }
 0x1a1   :  { %1122 = vpow2.f32 %v420_v9  ;;  %v395_v41 = vsub.f32 0.0, %v369_v16  ;;  %v1074_v5 = vpack.c.bf16 %v93_v4, %v92_v38  ;;  %v111_v9 = vld [vmem:[%s1647_s4 + $0xa8] sm:$0xff]  ;;  %v1078_v13 = vpack.c.bf16 %v95_v12, %v94_v11  ;;  %v113_v16 = vld [vmem:[%s1647_s4 + $0xb8] sm:$0xff]  ;;  %v114_v21 = vld [vmem:[%s1647_s4 + $0xc0] sm:$0xff] }
 0x1a2   :  { %v422_v20 = vmul.f32 1.442695, %v394_v17  ;;  %1124 = vpow2.f32 %v426_v15  ;;  %v1076_v10 = vpack.c.bf16 %v111_v9, %v110_v8  ;;  %v112_v15 = vld [vmem:[%s1647_s4 + $0xb0] sm:$0xff] }
 0x1a3   :  { %v424_v22 = vmul.f32 1.442695, %v395_v41  ;;  %v1080_v17 = vpack.c.bf16 %v113_v16, %v112_v15  ;;  %v97_v41 = vld [vmem:[%s1647_s4 + $0x38] sm:$0xff] }
 0x1a4   :  { %1126 = vpow2.f32 %v422_v20 }
 0x1a5   :  { %1128 = vpow2.f32 %v428_v18  ;;  %v1113_v26 = vpop.eup %1112  ;;  %v96_v18 = vld [vmem:[%s1647_s4 + $0x30] sm:$0xff] }
 0x1a6   :  { %1130 = vpow2.f32 %v424_v22  ;;  %v1115_v27 = vpop.eup %1114  ;;  %v455_v29 = vsel %vm454_vm2, %v1113_v26, %v453_v25  ;;  %v1082_v20 = vpack.c.bf16 %v97_v41, %v96_v18  ;;  %v115_v22 = vld [vmem:[%s1647_s4 + $0xc8] sm:$0xff]  ;;  %v98_v25 = vld [vmem:[%s1647_s4 + $0x40] sm:$0xff] }
 0x1a7   :  { %v1117_v24 = vpop.eup %1116  ;;  %v466_v31 = vsel %vm454_vm2, %v1115_v27, %v465_v28  ;;  %v1084_v23 = vpack.c.bf16 %v115_v22, %v114_v21  ;;  %v99_v26 = vld [vmem:[%s1647_s4 + $0x48] sm:$0xff]  ;;  %v116_v28 = vld [vmem:[%s1647_s4 + $0xd0] sm:$0xff] }
 0x1a8   :  { %v1086_v27 = vpack.c.bf16 %v99_v26, %v98_v25 }
 0x1a9   :  { %v1119_v30 = vpop.eup %1118 }
 0x1aa   :  { %v1121_v32 = vpop.eup %1120  ;;  %v457_v33 = vsel %vm456_vm3, %v1119_v30, %v455_v29  ;;  %v117_v29 = vld [vmem:[%s1647_s4 + $0xd8] sm:$0xff]  ;;  %v100_v30 = vld [vmem:[%s1647_s4 + $0x50] sm:$0xff] }
 0x1ab   :  { %v1123_v34 = vpop.eup %1122  ;;  %v467_v35 = vsel %vm456_vm3, %v1121_v32, %v466_v31  ;;  %v459_v19 = vsel %vm458_vm4, %v1117_v24, %v457_v33  ;;  %v1088_v24 = vpack.c.bf16 %v117_v29, %v116_v28  ;;  %v101_v31 = vld [vmem:[%s1647_s4 + $0x58] sm:$0xff]  ;;  %v118_v32 = vld [vmem:[%s1647_s4 + $0xe0] sm:$0xff] }
 0x1ac   :  { %v1125_v14 = vpop.eup %1124  ;;  %v468_v42 = vsel %vm458_vm4, %v1123_v34, %v467_v35  ;;  %v1090_v33 = vpack.c.bf16 %v101_v31, %v100_v30  ;;  %v119_v34 = vld [vmem:[%s1647_s4 + $0xe8] sm:$0xff] }
 0x1ad   :  { %v103_v35 = vld [vmem:[%s1647_s4 + $0x68] sm:$0xff] }
 0x1ae   :  { %v1127_v36 = vpop.eup %1126 }
 0x1af   :  { %v1129_v37 = vpop.eup %1128  ;;  %v461_v39 = vsel %vm460_vm5, %v1127_v36, %v459_v19  ;;  %v1092_v36 = vpack.c.bf16 %v119_v34, %v118_v32  ;;  %v120_v19 = vld [vmem:[%s1647_s4 + $0xf0] sm:$0xff] }
 0x1b0   :  { %v1131_v40 = vpop.eup %1130  ;;  %v463_v44 = vsel %vm462_vm6, %v1125_v14, %v461_v39  ;;  %v102_v14 = vld [vmem:[%s1647_s4 + $0x60] sm:$0xff] }
 0x1b1   :  { %v469_v43 = vsel %vm460_vm5, %v1131_v40, %v468_v42  ;;  %v1094_v39 = vpack.c.bf16 %v103_v35, %v102_v14  ;;  %v104_v42 = vld [vmem:[%s1647_s4 + $0x70] sm:$0xff] }
 0x1b2   :  { %v470_v45 = vsel %vm462_vm6, %v1129_v37, %v469_v43  ;;  %v121_v37 = vld [vmem:[%s1647_s4 + $0xf8] sm:$0xff] }
 0x1b3   :  { %537 = vmatprep.mubr.f32.mxu1 %v470_v45  ;;  %v1096_v40 = vpack.c.bf16 %v121_v37, %v120_v19  ;;  %v105_v43 = vld [vmem:[%s1647_s4 + $0x78] sm:$0xff] }
 0x1b4   :  { %538 = vmatmul.mubr.f32.vlgmr.msra.gmra.mrb[0].mxu1 %v463_v44  ;;  %v1098_v44 = vpack.c.bf16 %v105_v43, %v104_v42 }
 0x287   :  { %v966_v46 = vpop.f32.mrb[0].mxu1 }
 0x288   :  { %v967_v48 = vpop.f32.mrb[1].mxu1 }
 0x289   :  { %v968_v49 = vadd.f32 %v967_v48, %v966_v46 }
 0x28b   :  { %v540_v50 = vadd.f32 %v968_v49, %v897_v47 }
 0x28d   :  { %v553_v51 = vrot.slane %v540_v50, %v207_v63  ;;  %v546_v53 = vrot.slane %v540_v50, %v200_v58  ;;  %v567_v54 = vrot.slane %v540_v50, %v221_v62  ;;  %v560_v55 = vrot.slane %v540_v50, %v214_v57  ;;  %v106_v57 = vld [vmem:[%s1647_s4 + $0x80] sm:$0xff]  ;;  %v107_v62 = vld [vmem:[%s1647_s4 + $0x88] sm:$0xff] }
 0x28e   :  { %v581_v56 = vrot.slane %v540_v50, %v235_v2  ;;  %v574_v59 = vrot.slane %v540_v50, %v228_v3  ;;  %v595_v58 = vrot.slane %v540_v50, %v249_v6  ;;  %v588_v63 = vrot.slane %v540_v50, %v242_v7  ;;  %v90_v3 = vld [vmem:[%s1647_s4] sm:$0xff]  ;;  %v108_v7 = vld [vmem:[%s1647_s4 + $0x90] sm:$0xff] }
 0x28f   :  { %555 = vbcast.lane.b32.xlu1 %v553_v51, 256  ;;  %548 = vbcast.lane.b32.xlu0 %v546_v53, 256  ;;  %v1068_v2 = vpack.c.bf16 %v107_v62, %v106_v57  ;;  %v1070_v6 = vpack.c.bf16 %v91_v52, %v90_v3  ;;  %v1072_v1 = vpack.c.bf16 %v109_v60, %v108_v7 }
 0x291   :  { %1069 = vmatprep.subr.bf16.mxu0 %v1068_v2 }
 0x292   :  { %1071 = vmatpush3.bf16.msra.mxu0 %v1070_v6 }
 0x293   :  { %569 = vbcast.lane.b32.xlu1 %v567_v54, 256  ;;  %562 = vbcast.lane.b32.xlu0 %v560_v55, 256 }
 0x294   :  { %1073 = vmatprep.subr.bf16.mxu0 %v1072_v1 }
 0x296   :  { %1075 = vmatpush3.bf16.msra.mxu0 %v1074_v5 }
 0x297   :  { %583 = vbcast.lane.b32.xlu1 %v581_v56, 256  ;;  %576 = vbcast.lane.b32.xlu0 %v574_v59, 256 }
 0x298   :  { %1077 = vmatprep.subr.bf16.mxu0 %v1076_v10 }
 0x29a   :  { %1079 = vmatpush3.bf16.msra.mxu0 %v1078_v13 }
 0x29b   :  { %597 = vbcast.lane.b32.xlu1 %v595_v58, 256  ;;  %590 = vbcast.lane.b32.xlu0 %v588_v63, 256 }
 0x29c   :  { %1081 = vmatprep.subr.bf16.mxu0 %v1080_v17 }
 0x29e   :  { %1083 = vmatpush3.bf16.msra.mxu0 %v1082_v20 }
 0x29f   :  { %1085 = vmatprep.subr.bf16.mxu0 %v1084_v23 }
 0x2a2   :  { %1087 = vmatpush3.bf16.msra.mxu0 %v1086_v27 }
 0x2a3   :  { %1089 = vmatprep.subr.bf16.mxu0 %v1088_v24 }
 0x2a6   :  { %1091 = vmatpush3.bf16.msra.mxu0 %v1090_v33 }
 0x2a7   :  { %1093 = vmatprep.subr.bf16.mxu0 %v1092_v36 }
 0x2aa   :  { %1095 = vmatpush3.bf16.msra.mxu0 %v1094_v39 }
 0x2ab   :  { %1097 = vmatprep.subr.bf16.mxu0 %v1096_v40 }
 0x2ae   :  { %1099 = vmatpush3.bf16.msra.mxu0 %v1098_v44 }
 0x301   :  { %v556_v45 = vpop.permute.xlu1 %555  ;;  %v549_v46 = vpop.permute.xlu0 %548 }
 0x302   :  { %v601_v47 = vsub.f32 %v556_v45, %v1428_v61  ;;  %v602_v48 = vsub.f32 %v556_v45, %v1433_v0  ;;  %v599_v49 = vsub.f32 %v549_v46, %v1428_v61  ;;  %v600_v50 = vsub.f32 %v549_v46, %v1433_v0 }
 0x304   :  { %v617_v51 = vand.u32 2147483647, %v601_v47  ;;  %v618_v53 = vand.u32 2147483647, %v602_v48  ;;  %v615_v54 = vand.u32 2147483647, %v599_v49 }
 0x305   :  { %v616_v55 = vand.u32 2147483647, %v600_v50  ;;  %v570_v56 = vpop.permute.xlu1 %569  ;;  %v563_v59 = vpop.permute.xlu0 %562 }
 0x306   :  { %v643_v58 = vrot.slane %v617_v51, 4  ;;  %v649_v63 = vrot.slane %v618_v53, 4  ;;  %v631_v57 = vrot.slane %v615_v54, 4  ;;  %v605_v62 = vsub.f32 %v570_v56, %v1428_v61 }
 0x307   :  { %v637_v2 = vrot.slane %v616_v55, 4  ;;  %v606_v3 = vsub.f32 %v570_v56, %v1433_v0  ;;  %v603_v52 = vsub.f32 %v563_v59, %v1428_v61  ;;  %v604_v6 = vsub.f32 %v563_v59, %v1433_v0 }
 0x308   :  { %v644_v7 = vadd.f32 %v643_v58, %v617_v51  ;;  %v650_v60 = vadd.f32 %v649_v63, %v618_v53  ;;  %v632_v1 = vadd.f32 %v631_v57, %v615_v54  ;;  %v621_v38 = vand.u32 2147483647, %v605_v62 }
 0x309   :  { %v638_v4 = vadd.f32 %v637_v2, %v616_v55  ;;  %v622_v5 = vand.u32 2147483647, %v606_v3  ;;  %v619_v8 = vand.u32 2147483647, %v603_v52  ;;  %v620_v9 = vand.u32 2147483647, %v604_v6  ;;  %v584_v47 = vpop.permute.xlu1 %583  ;;  %v577_v62 = vpop.permute.xlu0 %576 }
 0x30a   :  { %v645_v10 = vrot.slane %v644_v7, 2  ;;  %v651_v11 = vrot.slane %v650_v60, 2  ;;  %v633_v12 = vrot.slane %v632_v1, 2  ;;  %v667_v13 = vrot.slane %v621_v38, 4 }
 0x30b   :  { %v639_v15 = vrot.slane %v638_v4, 2  ;;  %v673_v16 = vrot.slane %v622_v5, 4  ;;  %v655_v17 = vrot.slane %v619_v8, 4  ;;  %v661_v18 = vrot.slane %v620_v9, 4 }
 0x30c   :  { %v646_v41 = vadd.f32 %v645_v10, %v644_v7  ;;  %v652_v20 = vadd.f32 %v651_v11, %v650_v60  ;;  %v634_v21 = vadd.f32 %v633_v12, %v632_v1  ;;  %v668_v22 = vadd.f32 %v667_v13, %v621_v38 }
 0x30d   :  { %v640_v23 = vadd.f32 %v639_v15, %v638_v4  ;;  %v674_v25 = vadd.f32 %v673_v16, %v622_v5  ;;  %v656_v26 = vadd.f32 %v655_v17, %v619_v8  ;;  %v662_v27 = vadd.f32 %v661_v18, %v620_v9  ;;  %v598_v4 = vpop.permute.xlu1 %597  ;;  %v591_v17 = vpop.permute.xlu0 %590 }
 0x30e   :  { %v647_v28 = vrot.slane %v646_v41, 1  ;;  %v653_v29 = vrot.slane %v652_v20, 1  ;;  %v635_v24 = vrot.slane %v634_v21, 1  ;;  %v669_v30 = vrot.slane %v668_v22, 2 }
 0x30f   :  { %v641_v31 = vrot.slane %v640_v23, 1  ;;  %v675_v32 = vrot.slane %v674_v25, 2  ;;  %v657_v33 = vrot.slane %v656_v26, 2  ;;  %v663_v34 = vrot.slane %v662_v27, 2 }
 0x310   :  { %v648_v14 = vadd.f32 %v647_v28, %v646_v41  ;;  %v654_v35 = vadd.f32 %v653_v29, %v652_v20  ;;  %v636_v36 = vadd.f32 %v635_v24, %v634_v21  ;;  %v670_v19 = vadd.f32 %v669_v30, %v668_v22 }
 0x311   :  { %v642_v37 = vadd.f32 %v641_v31, %v640_v23  ;;  %v676_v39 = vadd.f32 %v675_v32, %v674_v25  ;;  %v658_v40 = vadd.f32 %v657_v33, %v656_v26  ;;  %v664_v42 = vadd.f32 %v663_v34, %v662_v27 }
 0x312   :  { %v729_v43 = vsub.f32 0.0, %v648_v14  ;;  %v730_v44 = vsub.f32 0.0, %v654_v35  ;;  %v727_v45 = vsub.f32 0.0, %v636_v36  ;;  %v671_v46 = vrot.slane %v670_v19, 1 }
 0x313   :  { %v728_v48 = vsub.f32 0.0, %v642_v37  ;;  %v677_v49 = vrot.slane %v676_v39, 1  ;;  %v659_v50 = vrot.slane %v658_v40, 1  ;;  %v665_v51 = vrot.slane %v664_v42, 1 }
 0x314   :  { %v747_v53 = vmul.f32 1.442695, %v729_v43  ;;  %v749_v54 = vmul.f32 1.442695, %v730_v44  ;;  %v743_v55 = vmul.f32 1.442695, %v727_v45  ;;  %v672_v56 = vadd.f32 %v671_v46, %v670_v19 }
 0x315   :  { %v745_v59 = vmul.f32 1.442695, %v728_v48  ;;  %v678_v58 = vadd.f32 %v677_v49, %v676_v39  ;;  %v660_v63 = vadd.f32 %v659_v50, %v658_v40  ;;  %v666_v57 = vadd.f32 %v665_v51, %v664_v42 }
 0x316   :  { %1132 = vpow2.f32 %v747_v53  ;;  %v733_v2 = vsub.f32 0.0, %v672_v56  ;;  %v609_v3 = vsub.f32 %v584_v47, %v1428_v61  ;;  %v610_v52 = vsub.f32 %v584_v47, %v1433_v0 }
 0x317   :  { %1134 = vpow2.f32 %v749_v54  ;;  %v734_v6 = vsub.f32 0.0, %v678_v58  ;;  %v731_v7 = vsub.f32 0.0, %v660_v63  ;;  %v732_v60 = vsub.f32 0.0, %v666_v57 }
 0x318   :  { %1136 = vpow2.f32 %v743_v55  ;;  %v625_v1 = vand.u32 2147483647, %v609_v3  ;;  %v626_v38 = vand.u32 2147483647, %v610_v52  ;;  %v755_v5 = vmul.f32 1.442695, %v733_v2 }
 0x319   :  { %1138 = vpow2.f32 %v745_v59  ;;  %v1602_v8 = vmul.f32 1.442695, %v734_v6  ;;  %v607_v11 = vsub.f32 %v577_v62, %v1428_v61  ;;  %v751_v12 = vmul.f32 1.442695, %v731_v7 }
 0x31a   :  { %v691_v9 = vrot.slane %v625_v1, 4  ;;  %v697_v10 = vrot.slane %v626_v38, 4  ;;  %v608_v13 = vsub.f32 %v577_v62, %v1433_v0  ;;  %v613_v15 = vsub.f32 %v598_v4, %v1428_v61 }
 0x31b   :  { %v614_v16 = vsub.f32 %v598_v4, %v1433_v0  ;;  %v753_v18 = vmul.f32 1.442695, %v732_v60  ;;  %v623_v21 = vand.u32 2147483647, %v607_v11  ;;  %1140 = vpow2.f32 %v755_v5 }
 0x31c   :  { %v692_v41 = vadd.f32 %v691_v9, %v625_v1  ;;  %v698_v20 = vadd.f32 %v697_v10, %v626_v38  ;;  %v624_v22 = vand.u32 2147483647, %v608_v13  ;;  %v629_v23 = vand.u32 2147483647, %v613_v15 }
 0x31d   :  { %v630_v25 = vand.u32 2147483647, %v614_v16  ;;  %v679_v28 = vrot.slane %v623_v21, 4  ;;  %v611_v29 = vsub.f32 %v591_v17, %v1428_v61  ;;  %v612_v32 = vsub.f32 %v591_v17, %v1433_v0 }
 0x31e   :  { %v693_v26 = vrot.slane %v692_v41, 2  ;;  %v699_v27 = vrot.slane %v698_v20, 2  ;;  %v685_v24 = vrot.slane %v624_v22, 4  ;;  %v715_v30 = vrot.slane %v629_v23, 4 }
 0x31f   :  { %v721_v31 = vrot.slane %v630_v25, 4  ;;  %v680_v35 = vadd.f32 %v679_v28, %v623_v21  ;;  %v627_v36 = vand.u32 2147483647, %v611_v29  ;;  %v628_v42 = vand.u32 2147483647, %v612_v32 }
 0x320   :  { %v1610_v33 = vpop.eup %1132  ;;  %v694_v34 = vadd.f32 %v693_v26, %v692_v41  ;;  %v700_v14 = vadd.f32 %v699_v27, %v698_v20  ;;  %v686_v37 = vadd.f32 %v685_v24, %v624_v22  ;;  %v716_v39 = vadd.f32 %v715_v30, %v629_v23 }
 0x321   :  { %v1612_v19 = vpop.eup %1134  ;;  %v722_v40 = vadd.f32 %v721_v31, %v630_v25  ;;  %v681_v45 = vrot.slane %v680_v35, 2  ;;  %v703_v46 = vrot.slane %v627_v36, 4  ;;  %v709_v50 = vrot.slane %v628_v42, 4 }
 0x322   :  { %v1614_v43 = vpop.eup %1136  ;;  %v695_v61 = vrot.slane %v694_v34, 1  ;;  %v701_v44 = vrot.slane %v700_v14, 1  ;;  %v687_v0 = vrot.slane %v686_v37, 2  ;;  %v717_v48 = vrot.slane %v716_v39, 2 }
 0x323   :  { %v1616_v47 = vpop.eup %1138  ;;  %v723_v49 = vrot.slane %v722_v40, 2  ;;  %v682_v54 = vadd.f32 %v681_v45, %v680_v35  ;;  %v704_v55 = vadd.f32 %v703_v46, %v627_v36  ;;  %v710_v63 = vadd.f32 %v709_v50, %v628_v42 }
 0x324   :  { %v696_v51 = vadd.f32 %v695_v61, %v694_v34  ;;  %v702_v53 = vadd.f32 %v701_v44, %v700_v14  ;;  %v688_v56 = vadd.f32 %v687_v0, %v686_v37  ;;  %v718_v59 = vadd.f32 %v717_v48, %v716_v39 }
 0x325   :  { %v724_v58 = vadd.f32 %v723_v49, %v722_v40  ;;  %1142 = vpow2.f32 %v751_v12  ;;  %v683_v62 = vrot.slane %v682_v54, 1  ;;  %v705_v2 = vrot.slane %v704_v55, 2  ;;  %v1141_v3 = vpop.eup %1140 }
 0x326   :  { %v737_v57 = vsub.f32 0.0, %v696_v51  ;;  %v689_v52 = vrot.slane %v688_v56, 1  ;;  %v719_v6 = vrot.slane %v718_v59, 1  ;;  %v711_v60 = vrot.slane %v710_v63, 2 }
 0x327   :  { %v725_v7 = vrot.slane %v724_v58, 1  ;;  %v738_v1 = vsub.f32 0.0, %v702_v53  ;;  %v684_v4 = vadd.f32 %v683_v62, %v682_v54  ;;  %v706_v5 = vadd.f32 %v705_v2, %v704_v55 }
 0x328   :  { %v763_v38 = vmul.f32 1.442695, %v737_v57  ;;  %v690_v9 = vadd.f32 %v689_v52, %v688_v56  ;;  %v720_v10 = vadd.f32 %v719_v6, %v718_v59  ;;  %v712_v13 = vadd.f32 %v711_v60, %v710_v63  ;;  %v898_v56 = vld [vmem:[%s1647_s4 + $0x100] ss:$0 sm:$0xff] }
 0x329   :  { %v726_v11 = vadd.f32 %v725_v7, %v724_v58  ;;  %1144 = vpow2.f32 %v753_v18  ;;  %v735_v15 = vsub.f32 0.0, %v684_v4  ;;  %v707_v16 = vrot.slane %v706_v5, 1 }
 0x32a   :  { %1146 = vpow2.f32 %v1602_v8  ;;  %v736_v12 = vsub.f32 0.0, %v690_v9  ;;  %v741_v17 = vsub.f32 0.0, %v720_v10  ;;  %v765_v20 = vmul.f32 1.442695, %v738_v1 }
 0x32b   :  { %v742_v41 = vsub.f32 0.0, %v726_v11  ;;  %v759_v21 = vmul.f32 1.442695, %v735_v15  ;;  %v708_v22 = vadd.f32 %v707_v16, %v706_v5  ;;  %v713_v23 = vrot.slane %v712_v13, 1 }
 0x32c   :  { %1148 = vpow2.f32 %v763_v38  ;;  %v761_v25 = vmul.f32 1.442695, %v736_v12  ;;  %v771_v26 = vmul.f32 1.442695, %v741_v17  ;;  %v795_v32 = vsel %vm450_vm0, %v1610_v33, %v1614_v43 }
 0x32d   :  { %1150 = vpow2.f32 %v759_v21  ;;  %v714_v27 = vadd.f32 %v713_v23, %v712_v13  ;;  %v739_v28 = vsub.f32 0.0, %v708_v22  ;;  %v773_v29 = vmul.f32 1.442695, %v742_v41 }
 0x32e   :  { %1152 = vpow2.f32 %v761_v25  ;;  %v802_v35 = vsel %vm450_vm0, %v1612_v19, %v1616_v47 }
 0x32f   :  { %v1143_v18 = vpop.eup %1142  ;;  %1154 = vpow2.f32 %v765_v20  ;;  %v740_v24 = vsub.f32 0.0, %v714_v27  ;;  %v767_v30 = vmul.f32 1.442695, %v739_v28 }
 0x330   :  { %1156 = vpow2.f32 %v771_v26  ;;  %v796_v14 = vsel %vm452_vm1, %v1143_v18, %v795_v32 }
 0x331   :  { %1158 = vpow2.f32 %v767_v30  ;;  %v769_v8 = vmul.f32 1.442695, %v740_v24  ;;  %v797_v40 = vsel %vm454_vm2, %v1141_v3, %v796_v14 }
 0x332   :  { %1160 = vpow2.f32 %v773_v29 }
 0x333   :  { %v1145_v31 = vpop.eup %1144  ;;  %1162 = vpow2.f32 %v769_v8 }
 0x334   :  { %v1147_v34 = vpop.eup %1146  ;;  %v803_v37 = vsel %vm452_vm1, %v1145_v31, %v802_v35 }
 0x335   :  { %v804_v45 = vsel %vm454_vm2, %v1147_v34, %v803_v37 }
 0x336   :  { %v1149_v36 = vpop.eup %1148 }
 0x337   :  { %v1151_v39 = vpop.eup %1150 }
 0x338   :  { %v1153_v42 = vpop.eup %1152  ;;  %v798_v61 = vsel %vm456_vm3, %v1151_v39, %v797_v40 }
 0x339   :  { %v1155_v44 = vpop.eup %1154  ;;  %v805_v43 = vsel %vm456_vm3, %v1153_v42, %v804_v45  ;;  %v799_v0 = vsel %vm458_vm4, %v1149_v36, %v798_v61 }
 0x33a   :  { %v1157_v33 = vpop.eup %1156  ;;  %v806_v49 = vsel %vm458_vm4, %v1155_v44, %v805_v43 }
 0x33b   :  { %v1159_v46 = vpop.eup %1158 }
 0x33c   :  { %v1161_v48 = vpop.eup %1160  ;;  %v800_v19 = vsel %vm460_vm5, %v1159_v46, %v799_v0 }
 0x33d   :  { %v1163_v47 = vpop.eup %1162  ;;  %v801_v51 = vsel %vm462_vm6, %v1157_v33, %v800_v19 }
 0x33e   :  { %v807_v50 = vsel %vm460_vm5, %v1163_v47, %v806_v49 }
 0x33f   :  { %v808_v53 = vsel %vm462_vm6, %v1161_v48, %v807_v50 }
 0x340   :  { %875 = vmatprep.mubr.f32.mxu0 %v808_v53 }
 0x341   :  { %876 = vmatmul.mubr.f32.vlgmr.msra.gmra.mrb[2].mxu0 %v801_v51 }
 0x414   :  { %v1001_v54 = vpop.f32.mrb[2].mxu0 }
 0x415   :  { %v1002_v55 = vpop.f32.mrb[3].mxu0 }
 0x416   :  { %v1003_v59 = vadd.f32 %v1002_v55, %v1001_v54 }
 0x418   :  { %v878_v58 = vadd.f32 %v1003_v59, %v898_v56 }
 0x41a   :  { %881 = vmax.xlane.f32.xlu0 %v878_v58 }
 0x4a7   :  { %v882_v63 = vpop.xlane.xlu0 %881 }
 0x4a8   :  { %v883_v57 = vsub.f32 %v878_v58, %v882_v63 }
 0x4aa   :  { %v884_v62 = vmul.f32 1.442695, %v883_v57 }
 0x4ac   :  { %1164 = vpow2.f32 %v884_v62 }
 0x4b6   :  { %v1165_v2 = vpop.eup %1164 }
 0x4b7   :  { %886 = vadd.xlane.f32.xlu1 %v1165_v2 }
 0x544   :  { %v887_v3 = vpop.xlane.xlu1 %886 }
 0x545   :  { %1166 = vlog2.f32 %v887_v3 }
 0x54f   :  { %v1167_v52 = vpop.eup %1166 }
 0x550   :  { %v889_v6 = vmul.f32 0.6931472, %v1167_v52 }
 0x552   :  { %v890_v7 = vsub.f32 %v883_v57, %v889_v6 }
 0x554   :  { %891 = vst [vmem:[%s1648_s5] sm:$0xff] %v890_v7 }

</bundles_post_ra>
